<compile_context>
chip_gen: v7x
topology: tpu7x:2x2x1
jax: 0.10.0
libtpu: 0.0.40
codegen_flags: <defaults>
</compile_context>

<pallas_src>
import random
from functools import partial

import jax
import jax.numpy as jnp
from jax.experimental import pallas as pl
from jax.experimental.pallas import tpu as pltpu


def _shifted_bilinear_matrix(out_size: int, in_full: int, crop_size: int, start):
    """(out_size, in_full) matrix M with
         M @ x == bilinear_resize(x[start : start + crop_size], out_size).

    Half-pixel centers / align_corners=False (matches torchvision F.resize
    bilinear; the crop is never larger than the output so antialias is moot).
    `start` may be a traced int32 scalar; the sizes are static.
    """
    scale = crop_size / out_size
    dst = jnp.arange(out_size, dtype=jnp.float32)
    src = jnp.clip((dst + 0.5) * scale - 0.5, 0.0, float(crop_size - 1))
    x0 = jnp.floor(src).astype(jnp.int32)
    x1 = jnp.minimum(x0 + 1, crop_size - 1)
    w1 = src - x0.astype(jnp.float32)
    w0 = 1.0 - w1
    # Shift tap indices into full-image coordinates (traced start -> no recompile).
    start = jnp.asarray(start, jnp.int32)
    x0 = x0 + start
    x1 = x1 + start
    rows = jnp.arange(out_size)
    m = jnp.zeros((out_size, in_full), jnp.float32)
    m = m.at[rows, x0].add(w0)
    m = m.at[rows, x1].add(w1)
    return m


def _jitter_kernel(rgb_ref, wh_ref, wwT_ref, out_ref):
    C, H, W = rgb_ref.shape
    # W-axis resize: all channels batched into ONE MXU matmul (C*H sublanes).
    x = rgb_ref[...].reshape(C * H, W).astype(jnp.bfloat16)
    wwT = wwT_ref[...].astype(jnp.bfloat16)                    # (W, W)
    t = jnp.dot(x, wwT, preferred_element_type=jnp.float32)    # (C*H, W) f32
    # H-axis resize for the current output row-tile: short unrolled loop over C.
    wh = wh_ref[...].astype(jnp.bfloat16)                      # (TH, H)
    for c in range(C):
        tc = t[c * H:(c + 1) * H, :].astype(jnp.bfloat16)      # (H, W)
        out_ref[c, :, :] = jnp.dot(
            wh, tc, preferred_element_type=jnp.float32
        ).astype(out_ref.dtype)


def _pick_row_tile(h: int) -> int:
    """Output-row tile: single tile for small/medium images; H-tiled for large
    images to stay inside v7x's VMEM budget and let both TCs split the grid."""
    if h <= 512:
        return h
    for th in (512, 256, 128, 64, 32, 16, 8):
        if h % th == 0:
            return th
    return h


@partial(jax.jit, static_argnames=("crop_h", "crop_w"))
def _crop_resize_pallas(rgb, start_h, start_w, *, crop_h: int, crop_w: int):
    """rgb: (C, H, W).  Crop [start_h:+crop_h, start_w:+crop_w] and bilinearly
    resize back to (H, W); crop selection is baked into the matmul operands."""
    C, H, W = rgb.shape
    wh = _shifted_bilinear_matrix(H, H, crop_h, start_h)        # (H, H)
    wwT = _shifted_bilinear_matrix(W, W, crop_w, start_w).T     # (W, W)

    th = _pick_row_tile(H)
    return pl.pallas_call(
        _jitter_kernel,
        out_shape=jax.ShapeDtypeStruct((C, H, W), rgb.dtype),
        grid=(H // th,),
        in_specs=[
            pl.BlockSpec((C, H, W), lambda i: (0, 0, 0)),  # full image, resident
            pl.BlockSpec((th, H), lambda i: (i, 0)),       # row-tile of Wh
            pl.BlockSpec((W, W), lambda i: (0, 0)),        # WwT, resident
        ],
        out_specs=pl.BlockSpec((C, th, W), lambda i: (0, i, 0)),
        compiler_params=pltpu.CompilerParams(
            dimension_semantics=("parallel",)),
    )(rgb, wh, wwT)


class RandomJitter:
    """JAX/Pallas port of the PyTorch RandomJitter transform."""

    def __init__(self, max_drift: float = 0.01, prob: float = 0.5):
        if not 0 <= max_drift < 1:
            raise ValueError(f"max_drift must be in range [0, 1), got {max_drift}")
        self.max_drift = max_drift
        self.prob = prob

    def __call__(self, rgb, tir, target):
        # torch.rand(1) < prob  ->  host-side uniform draw (no device readback).
        if random.random() < self.prob:
            _, h, w = rgb.shape
            crop_h = max(int(h * (1 - self.max_drift)), 16)
            crop_w = max(int(w * (1 - self.max_drift)), 16)
            start_h = random.randint(0, h - crop_h)
            start_w = random.randint(0, w - crop_w)
            offset_range = min(h - start_h - crop_h, w - start_w - crop_w, 10)
            if offset_range > 0:
                dx = random.randint(-offset_range, offset_range)
                dy = random.randint(-offset_range, offset_range)
                start_h += dy
                start_w += dx
                start_h = max(0, min(start_h, h - crop_h))
                start_w = max(0, min(start_w, w - crop_w))
            resized_rgb = _crop_resize_pallas(
                rgb, jnp.int32(start_h), jnp.int32(start_w),
                crop_h=crop_h, crop_w=crop_w)
            # TODO(synk): like the reference, tir and target are passed through untouched.
            return resized_rgb, tir, target
        return rgb, tir, target


if __name__ == "__main__":
    random.seed(0)
    key = jax.random.PRNGKey(0)
    k_rgb, k_tir = jax.random.split(key)

    C, H, W = 3, 32, 32
    rgb = jax.random.uniform(k_rgb, (C, H, W), dtype=jnp.float32)
    tir = jax.random.uniform(k_tir, (C, H, W), dtype=jnp.float32)
    target = {"boxes": jnp.zeros((1, 4), jnp.float32)}

    # prob=1.0 so the kernel path is exercised; max_drift=0.2 -> 25x25 crop.
    jitter = RandomJitter(max_drift=0.2, prob=1.0)
    out_rgb, out_tir, out_target = jitter(rgb, tir, target)
    jax.block_until_ready(out_rgb)
    assert out_rgb.shape == (C, H, W) and out_rgb.dtype == rgb.dtype
    assert bool(jnp.all(jnp.isfinite(out_rgb)))

    # Correctness spot-check with known offsets vs a pure-JAX reference
    # (bf16 MXU operands -> loose tolerance).
    ch, cw, sh, sw = 25, 25, 3, 2
    got = _crop_resize_pallas(rgb, jnp.int32(sh), jnp.int32(sw), crop_h=ch, crop_w=cw)
    ref = jax.image.resize(rgb[:, sh:sh + ch, sw:sw + cw], (C, H, W), method="bilinear")
    err = float(jnp.max(jnp.abs(got - ref)))
    assert err < 5e-2, f"max abs err {err}"

    print("KERNEL_OK")
</pallas_src>

<mosaic_0001>
module attributes {stable_mosaic.version = 11 : i64} {
  func.func private @main(%arg0: i32) attributes {dimension_semantics = [#tpu.dimension_semantics<core_parallel>], iteration_bounds = array<i64: 2>, tpu.core_type = #tpu.core_type<sc_scalar_subcore>, window_params = []} {
    return
  }
}

module attributes {stable_mosaic.version = 11 : i64} {
  func.func private @main(%arg0: i32) attributes {dimension_semantics = [#tpu.dimension_semantics<core_parallel>], iteration_bounds = array<i64: 2>, tpu.core_type = #tpu.core_type<sc_scalar_subcore>, window_params = []} {
    return
  }
}

module attributes {stable_mosaic.version = 11 : i64} {
  func.func @_jitter_kernel(%arg0: i32, %arg1: memref<3x32x32xf32, #tpu.memory_space<vmem>>, %arg2: memref<32x32xf32, #tpu.memory_space<vmem>>, %arg3: memref<32x32xf32, #tpu.memory_space<vmem>>, %arg4: memref<3x32x32xf32, #tpu.memory_space<vmem>>) attributes {dimension_semantics = [#tpu.dimension_semantics<parallel>], iteration_bounds = array<i64: 1>, scalar_prefetch = 0 : i64, scratch_operands = 0 : i64, tpu.core_type = #tpu.core_type<tc>, window_params = [{pipeline_mode = #tpu.pipeline_mode<synchronous>, transform_indices = @transform_0, window_bounds = array<i64: 3, 32, 32>}, {transform_indices = @transform_1, window_bounds = array<i64: 32, 32>}, {pipeline_mode = #tpu.pipeline_mode<synchronous>, transform_indices = @transform_2, window_bounds = array<i64: 32, 32>}, {transform_indices = @transform_3, window_bounds = array<i64: 3, 32, 32>}]} {
    %c0 = arith.constant 0 : index
    %c0_0 = arith.constant 0 : index
    %c0_1 = arith.constant 0 : index
    %0 = vector.load %arg1[%c0, %c0_0, %c0_1] : memref<3x32x32xf32, #tpu.memory_space<vmem>>, vector<3x32x32xf32>
    %1 = vector.shape_cast %0 : vector<3x32x32xf32> to vector<96x32xf32>
    %2 = arith.truncf %1 : vector<96x32xf32> to vector<96x32xbf16>
    %c0_2 = arith.constant 0 : index
    %c0_3 = arith.constant 0 : index
    %3 = vector.load %arg3[%c0_2, %c0_3] : memref<32x32xf32, #tpu.memory_space<vmem>>, vector<32x32xf32>
    %4 = arith.truncf %3 : vector<32x32xf32> to vector<32x32xbf16>
    %cst = arith.constant dense<0.000000e+00> : vector<96x32xf32>
    %5 = tpu.matmul %2, %4, %cst {dimension_numbers = #tpu.dot_dimension_numbers<[1], [0], [0], [1], [0, 0, 1, 1], [], []>} : vector<96x32xbf16>, vector<32x32xbf16>, vector<96x32xf32> -> vector<96x32xf32>
    %c0_4 = arith.constant 0 : index
    %c0_5 = arith.constant 0 : index
    %6 = vector.load %arg2[%c0_4, %c0_5] : memref<32x32xf32, #tpu.memory_space<vmem>>, vector<32x32xf32>
    %7 = arith.truncf %6 : vector<32x32xf32> to vector<32x32xbf16>
    %8 = vector.extract_strided_slice %5 {offsets = [0, 0], sizes = [32, 32], strides = [1, 1]} : vector<96x32xf32> to vector<32x32xf32>
    %9 = arith.truncf %8 : vector<32x32xf32> to vector<32x32xbf16>
    %cst_6 = arith.constant dense<0.000000e+00> : vector<32x32xf32>
    %10 = tpu.matmul %7, %9, %cst_6 {dimension_numbers = #tpu.dot_dimension_numbers<[1], [0], [0], [1], [0, 0, 1, 1], [], []>} : vector<32x32xbf16>, vector<32x32xbf16>, vector<32x32xf32> -> vector<32x32xf32>
    %c0_7 = arith.constant 0 : index
    %c0_8 = arith.constant 0 : index
    %c0_9 = arith.constant 0 : index
    %11 = vector.load %arg4[%c0_7, %c0_8, %c0_9] : memref<3x32x32xf32, #tpu.memory_space<vmem>>, vector<1x32x32xf32>
    %12 = vector.shape_cast %11 : vector<1x32x32xf32> to vector<32x32xf32>
    %13 = vector.shape_cast %10 : vector<32x32xf32> to vector<1x32x32xf32>
    tpu.vector_store %arg4[%c0_7, %c0_8, %c0_9], %13 {strides = array<i32>} : memref<3x32x32xf32, #tpu.memory_space<vmem>>, vector<1x32x32xf32>,
    %14 = vector.extract_strided_slice %5 {offsets = [32, 0], sizes = [32, 32], strides = [1, 1]} : vector<96x32xf32> to vector<32x32xf32>
    %15 = arith.truncf %14 : vector<32x32xf32> to vector<32x32xbf16>
    %cst_10 = arith.constant dense<0.000000e+00> : vector<32x32xf32>
    %16 = tpu.matmul %7, %15, %cst_10 {dimension_numbers = #tpu.dot_dimension_numbers<[1], [0], [0], [1], [0, 0, 1, 1], [], []>} : vector<32x32xbf16>, vector<32x32xbf16>, vector<32x32xf32> -> vector<32x32xf32>
    %c1 = arith.constant 1 : index
    %c0_11 = arith.constant 0 : index
    %c0_12 = arith.constant 0 : index
    %17 = vector.load %arg4[%c1, %c0_11, %c0_12] : memref<3x32x32xf32, #tpu.memory_space<vmem>>, vector<1x32x32xf32>
    %18 = vector.shape_cast %17 : vector<1x32x32xf32> to vector<32x32xf32>
    %19 = vector.shape_cast %16 : vector<32x32xf32> to vector<1x32x32xf32>
    tpu.vector_store %arg4[%c1, %c0_11, %c0_12], %19 {strides = array<i32>} : memref<3x32x32xf32, #tpu.memory_space<vmem>>, vector<1x32x32xf32>,
    %20 = vector.extract_strided_slice %5 {offsets = [64, 0], sizes = [32, 32], strides = [1, 1]} : vector<96x32xf32> to vector<32x32xf32>
    %21 = arith.truncf %20 : vector<32x32xf32> to vector<32x32xbf16>
    %cst_13 = arith.constant dense<0.000000e+00> : vector<32x32xf32>
    %22 = tpu.matmul %7, %21, %cst_13 {dimension_numbers = #tpu.dot_dimension_numbers<[1], [0], [0], [1], [0, 0, 1, 1], [], []>} : vector<32x32xbf16>, vector<32x32xbf16>, vector<32x32xf32> -> vector<32x32xf32>
    %c2 = arith.constant 2 : index
    %c0_14 = arith.constant 0 : index
    %c0_15 = arith.constant 0 : index
    %23 = vector.load %arg4[%c2, %c0_14, %c0_15] : memref<3x32x32xf32, #tpu.memory_space<vmem>>, vector<1x32x32xf32>
    %24 = vector.shape_cast %23 : vector<1x32x32xf32> to vector<32x32xf32>
    %25 = vector.shape_cast %22 : vector<32x32xf32> to vector<1x32x32xf32>
    tpu.vector_store %arg4[%c2, %c0_14, %c0_15], %25 {strides = array<i32>} : memref<3x32x32xf32, #tpu.memory_space<vmem>>, vector<1x32x32xf32>,
    return
  }
  func.func @transform_0(%arg0: i32) -> (i32, i32, i32) {
    %c0_i32 = arith.constant 0 : i32
    %c0_i32_0 = arith.constant 0 : i32
    %c0_i32_1 = arith.constant 0 : i32
    %c0_i32_2 = arith.constant 0 : i32
    return %c0_i32, %c0_i32_0, %c0_i32_1 : i32, i32, i32
  }
  func.func @transform_1(%arg0: i32) -> (i32, i32) {
    %c0_i32 = arith.constant 0 : i32
    %c0_i32_0 = arith.constant 0 : i32
    return %arg0, %c0_i32 : i32, i32
  }
  func.func @transform_2(%arg0: i32) -> (i32, i32) {
    %c0_i32 = arith.constant 0 : i32
    %c0_i32_0 = arith.constant 0 : i32
    %c0_i32_1 = arith.constant 0 : i32
    return %c0_i32, %c0_i32_0 : i32, i32
  }
  func.func @transform_3(%arg0: i32) -> (i32, i32, i32) {
    %c0_i32 = arith.constant 0 : i32
    %c0_i32_0 = arith.constant 0 : i32
    %c0_i32_1 = arith.constant 0 : i32
    return %c0_i32, %arg0, %c0_i32_0 : i32, i32, i32
  }
}

</mosaic_0001>

<bundles_post_ra>
// kernel: _crop_resize_pallas.1
= control target key start
LH: loop header
LB: loop body
LE: loop exit
PB: predicated region body
PF: predicated region fallthrough
CT: control target
= control target key end

     0   :  { %8 = vsyncpa [#allocation3], 0  ;;  %s600_s0 = inlined_call_operand.vmem [shape: f32[3,32,32], index: 0, kind: input, shape index: {}]   ;;  %s601_s1 = inlined_call_operand.hbm [shape: f32[32,32], index: 1, kind: input, shape index: {}]   ;;  %s602_s2 = inlined_call_operand.vmem [shape: f32[32,32], index: 2, kind: input, shape index: {}]   ;;  %s603_s3 = inlined_call_operand.hbm [shape: f32[3,32,32], index: 3, kind: output, shape index: {}]  }
   0x1   :  { %9 = vsyncpa [#allocation4], 0  ;;  %s474_s12 = smov [#allocation2]   ;;  %s426_s16 = scalar_lea.hbm %s601_s1, 512 }
   0x2   :  { %s17_s13 = sshll.u32 %s474_s12, 4  ;;  %p427_p0 = scmp.ne.s32.totalorder %s601_s1, %s426_s16  ;;  %s18_s13 = int_to_ptr.vmem [resolvable:$true] %s17_s13 }
   0x3   :  { %p430_p1 = scmp.lt.u32.totalorder %s426_s16, %s601_s1 }
   0x5   :  { %p432_p2 = pnand %p430_p1, %p427_p0 }
   0x7   :  { %435 = shalt.err (!%p432_p2)
}
   0x8   :  { %s436_s21 = scalar_lea.vmem %s18_s13, 512  ;;  %p441_p4 = scmp.lt.s32.totalorder %s18_s13, %s18_s13 }
   0x9   :  { %p437_p3 = scmp.ne.s32.totalorder %s18_s13, %s436_s21  ;;  %p442_p5 = scmp.lt.s32.totalorder %s436_s21, %s436_s21 }
   0xb   :  { %p443_p6 = por %p442_p5, %p441_p4 }
   0xd   :  { %p444_p7 = pnand %p443_p6, %p437_p3 }
   0xf   :  { %447 = shalt.err (!%p444_p7)
}
  0x10   :  { %s475_s22 = smov 128   ;;  %s476_s23 = smov 8  }
  0x11   :  { %23 = dma.hbm_to_vmem [thread:$0]  %s601_s1, 512, %s18_s13, [#allocation3], %s475_s22, %s475_s22, %s476_s23  }
  0x12   :  { %470 = dma.done.wait [#allocation3], 512  }
  0x13   :  { %471 = vsyncadd [#allocation3], 4294966784  ;;  %v48_v0 = vld [vmem:[%s602_s2] sm:$0xff]  ;;  %v49_v1 = vld [vmem:[%s602_s2 + $0x8] sm:$0xff]  ;;  %vm54_vm0 = vcmask 261120  }
  0x14   :  { %v50_v2 = vld [vmem:[%s602_s2 + $0x10] sm:$0xff]  ;;  %v52_v3 = vpack.c.bf16 %v49_v1, %v48_v0  ;;  %v51_v4 = vld [vmem:[%s602_s2 + $0x18] sm:$0xff]  ;;  %v30_v5 = vld [vmem:[%s600_s0] sm:$0xff] }
  0x15   :  { %v31_v6 = vld [vmem:[%s600_s0 + $0x8] sm:$0xff]  ;;  %v53_v7 = vpack.c.bf16 %v51_v4, %v50_v2  ;;  %v32_v9 = vld [vmem:[%s600_s0 + $0x10] sm:$0xff]  ;;  %v33_v10 = vld [vmem:[%s600_s0 + $0x18] sm:$0xff] }
  0x16   :  { %v42_v8 = vpack.c.bf16 %v31_v6, %v30_v5  ;;  %382 = vmatprep.subr.bf16.mxu0 %v52_v3  ;;  %v34_v11 = vld [vmem:[%s600_s0 + $0x20] sm:$0xff]  ;;  %v35_v12 = vld [vmem:[%s600_s0 + $0x28] sm:$0xff]  ;;  %v43_v13 = vpack.c.bf16 %v33_v10, %v32_v9  ;;  %v36_v15 = vld [vmem:[%s600_s0 + $0x30] sm:$0xff] }
  0x17   :  { %383 = vmatpush3.bf16.msra.mxu0 %v52_v3  ;;  %v44_v14 = vpack.c.bf16 %v35_v12, %v34_v11  ;;  %v37_v16 = vld [vmem:[%s600_s0 + $0x38] sm:$0xff]  ;;  %v38_v17 = vld [vmem:[%s600_s0 + $0x40] sm:$0xff]  ;;  %v39_v18 = vld [vmem:[%s600_s0 + $0x48] sm:$0xff] }
  0x18   :  { %386 = vmatprep.mubr.msk.bf16.mxu0 %vm54_vm0, %v42_v8  ;;  %384 = vmatprep.subr.bf16.mxu0 %v53_v7  ;;  %v45_v19 = vpack.c.bf16 %v37_v16, %v36_v15  ;;  %v46_v20 = vpack.c.bf16 %v39_v18, %v38_v17  ;;  %v40_v21 = vld [vmem:[%s600_s0 + $0x50] sm:$0xff]  ;;  %v41_v22 = vld [vmem:[%s600_s0 + $0x58] sm:$0xff]  ;;  %v154_v24 = vld [vmem:[#allocation2] sm:$0xff]  ;;  %s477_s0 = smov [#allocation5]  }
  0x19   :  { %v47_v23 = vpack.c.bf16 %v41_v22, %v40_v21  ;;  %v155_v25 = vld [vmem:[#allocation2 + $0x8] sm:$0xff]  ;;  %v156_v33 = vld [vmem:[#allocation2 + $0x10] sm:$0xff]  ;;  %v157_v34 = vld [vmem:[#allocation2 + $0x18] sm:$0xff]  ;;  %s338_s4 = sshll.u32 %s477_s0, 4  ;;  %s339_s4 = int_to_ptr.vmem [resolvable:$true] %s338_s4 }
  0x1a   :  { %v158_v26 = vpack.c.bf16 %v155_v25, %v154_v24  ;;  %v159_v38 = vpack.c.bf16 %v157_v34, %v156_v33  ;;  %s448_s5 = scalar_lea.vmem %s339_s4, 1536  ;;  %p453_p9 = scmp.lt.s32.totalorder %s339_s4, %s339_s4 }
  0x1b   :  { %385 = vmatpush3.bf16.msra.mxu0 %v53_v7  ;;  %p449_p8 = scmp.ne.s32.totalorder %s339_s4, %s448_s5  ;;  %p454_p10 = scmp.lt.s32.totalorder %s448_s5, %s448_s5 }
  0x1c   :  { %402 = vmatprep.mubr.msk.bf16.mxu1 %vm54_vm0, %v158_v26 }
  0x1d   :  { %p455_p11 = por %p454_p10, %p453_p9 }
  0x1e   :  { %387 = vmatmul.mubr.msk.bf16.vlgmr.msra.gmra.mrb[0].mxu0 %vm54_vm0, %v43_v13 }
  0x1f   :  { %390 = vmatprep.mubr.msk.bf16.mxu0 %vm54_vm0, %v44_v14  ;;  %p456_p12 = pnand %p455_p11, %p449_p8 }
  0x26   :  { %391 = vmatmul.mubr.msk.bf16.gmra.mrb[4].mxu0 %vm54_vm0, %v45_v19 }
  0x27   :  { %394 = vmatprep.mubr.msk.bf16.mxu0 %vm54_vm0, %v46_v20 }
  0x2e   :  { %395 = vmatmul.mubr.msk.bf16.gmra.mrb[8].mxu0 %vm54_vm0, %v47_v23 }
  0xf1   :  { %v388_v27 = vpop.f32.mrb[0].mxu0 }
  0xf2   :  { %v107_v28 = vpop.f32.mrb[1].mxu0 }
  0xf3   :  { %v389_v29 = vpop.f32.mrb[2].mxu0 }
  0xf4   :  { %v161_v30 = vpack.c.bf16 %v389_v29, %v388_v27  ;;  %v110_v31 = vpop.f32.mrb[3].mxu0 }
  0xf5   :  { %v160_v32 = vpack.c.bf16 %v110_v31, %v107_v28 }
  0xf7   :  { %398 = vmatprep.subr.bf16.mxu1 %v160_v32 }
  0xf8   :  { %399 = vmatpush3.bf16.msra.mxu1 %v160_v32 }
  0xf9   :  { %v392_v35 = vpop.f32.mrb[4].mxu0  ;;  %400 = vmatprep.subr.bf16.mxu1 %v161_v30 }
  0xfa   :  { %v123_v36 = vpop.f32.mrb[5].mxu0 }
  0xfb   :  { %v393_v37 = vpop.f32.mrb[6].mxu0 }
  0xfc   :  { %v222_v39 = vpack.c.bf16 %v393_v37, %v392_v35  ;;  %v126_v40 = vpop.f32.mrb[7].mxu0  ;;  %401 = vmatpush3.bf16.msra.mxu1 %v161_v30 }
  0xfd   :  { %v221_v41 = vpack.c.bf16 %v126_v40, %v123_v36 }
  0xff   :  { %403 = vmatmul.mubr.msk.bf16.vlgmr.msra.gmra.mrb[0].mxu1 %vm54_vm0, %v159_v38  ;;  %406 = vmatprep.subr.bf16.mxu1 %v221_v41 }
 0x100   :  { %407 = vmatpush3.bf16.msra.mxu1 %v221_v41  ;;  %410 = vmatprep.mubr.msk.bf16.mxu1 %vm54_vm0, %v158_v26 }
 0x101   :  { %v396_v42 = vpop.f32.mrb[8].mxu0  ;;  %408 = vmatprep.subr.bf16.mxu1 %v222_v39 }
 0x102   :  { %v139_v43 = vpop.f32.mrb[9].mxu0 }
 0x103   :  { %v397_v44 = vpop.f32.mrb[10].mxu0 }
 0x104   :  { %v278_v45 = vpack.c.bf16 %v397_v44, %v396_v42  ;;  %v142_v46 = vpop.f32.mrb[11].mxu0  ;;  %409 = vmatpush3.bf16.msra.mxu1 %v222_v39 }
 0x105   :  { %v277_v47 = vpack.c.bf16 %v142_v46, %v139_v43 }
 0x107   :  { %411 = vmatmul.mubr.msk.bf16.vlgmr.msra.gmra.mrb[4].mxu1 %vm54_vm0, %v159_v38  ;;  %414 = vmatprep.subr.bf16.mxu1 %v277_v47 }
 0x108   :  { %415 = vmatpush3.bf16.msra.mxu1 %v277_v47  ;;  %418 = vmatprep.mubr.msk.bf16.mxu1 %vm54_vm0, %v158_v26 }
 0x109   :  { %416 = vmatprep.subr.bf16.mxu1 %v278_v45 }
 0x10c   :  { %417 = vmatpush3.bf16.msra.mxu1 %v278_v45 }
 0x10f   :  { %419 = vmatmul.mubr.msk.bf16.vlgmr.msra.gmra.mrb[8].mxu1 %vm54_vm0, %v159_v38 }
 0x1d2   :  { %v404_v48 = vpop.f32.mrb[0].mxu1 }
 0x1d3   :  { %219 = vst.msk [vmem:[#allocation5 + $0x10] sm:$0xff] %vm54_vm0, %v404_v48  ;;  %v202_v49 = vpop.f32.mrb[1].mxu1 }
 0x1d4   :  { %217 = vst.msk [vmem:[#allocation5] sm:$0xff] %vm54_vm0, %v202_v49  ;;  %v405_v50 = vpop.f32.mrb[2].mxu1 }
 0x1d5   :  { %220 = vst.msk [vmem:[#allocation5 + $0x18] sm:$0xff] %vm54_vm0, %v405_v50  ;;  %v205_v51 = vpop.f32.mrb[3].mxu1 }
 0x1d6   :  { %218 = vst.msk [vmem:[#allocation5 + $0x8] sm:$0xff] %vm54_vm0, %v205_v51 }
 0x1da   :  { %v412_v52 = vpop.f32.mrb[4].mxu1 }
 0x1db   :  { %275 = vst.msk [vmem:[#allocation5 + $0x30] sm:$0xff] %vm54_vm0, %v412_v52  ;;  %v257_v53 = vpop.f32.mrb[5].mxu1 }
 0x1dc   :  { %273 = vst.msk [vmem:[#allocation5 + $0x20] sm:$0xff] %vm54_vm0, %v257_v53  ;;  %v413_v54 = vpop.f32.mrb[6].mxu1 }
 0x1dd   :  { %276 = vst.msk [vmem:[#allocation5 + $0x38] sm:$0xff] %vm54_vm0, %v413_v54  ;;  %v260_v55 = vpop.f32.mrb[7].mxu1 }
 0x1de   :  { %274 = vst.msk [vmem:[#allocation5 + $0x28] sm:$0xff] %vm54_vm0, %v260_v55 }
 0x1e2   :  { %v420_v56 = vpop.f32.mrb[8].mxu1 }
 0x1e3   :  { %331 = vst.msk [vmem:[#allocation5 + $0x50] sm:$0xff] %vm54_vm0, %v420_v56  ;;  %v313_v57 = vpop.f32.mrb[9].mxu1 }
 0x1e4   :  { %329 = vst.msk [vmem:[#allocation5 + $0x40] sm:$0xff] %vm54_vm0, %v313_v57  ;;  %v421_v58 = vpop.f32.mrb[10].mxu1 }
 0x1e5   :  { %332 = vst.msk [vmem:[#allocation5 + $0x58] sm:$0xff] %vm54_vm0, %v421_v58  ;;  %v316_v59 = vpop.f32.mrb[11].mxu1 }
 0x1e6   :  { %330 = vst.msk [vmem:[#allocation5 + $0x48] sm:$0xff] %vm54_vm0, %v316_v59 }
 0x1e7   :  { %459 = shalt.err (!%p456_p12)
}
 0x1e8   :  { %s460_s7 = scalar_lea.hbm %s603_s3, 1536 }
 0x1e9   :  { %p461_p13 = scmp.ne.s32.totalorder %s603_s3, %s460_s7  ;;  %p464_p0 = scmp.lt.u32.totalorder %s460_s7, %s603_s3 }
 0x1eb   :  { %p466_p1 = pnand %p464_p0, %p461_p13 }
 0x1ed   :  { %469 = shalt.err (!%p466_p1)
}
 0x1ee   :  { %344 = dma.vmem_to_hbm [thread:$0]  %s339_s4, 1536, %s603_s3, [#allocation4], %s475_s22, %s475_s22, %s476_s23  }
 0x1ef   :  { %472 = dma.done.wait [#allocation4], 1536  }
 0x1f0   :  { %473 = vsyncadd [#allocation4], 4294965760 }
 0x1f1   :  { %348 = vsyncpa [#allocation3], 1 }
 0x1f2   :  { %349 = vsyncpa [#allocation4], 1 }

</bundles_post_ra>
